<compile_context>
chip_gen: v5e
topology: v5e:2x2
jax: 0.10.0
libtpu: 0.0.40
codegen_flags: <defaults>
</compile_context>

<pallas_src>
from functools import partial

import jax
import jax.numpy as jnp
from jax import lax
from jax.experimental import pallas as pl
from jax.experimental.pallas import tpu as pltpu

GUMBEL_TEMP = 1.0          # module constant (tau); == 1 -> no divide in-kernel
_LANES = 128               # TPU lane width
_SUB_BLOCK = 1024          # sublanes per fast-path grid step (sweepable 512-4096)


def _round_up(a, b):
    return ((a + b - 1) // b) * b


# -----------------------------------------------------------------------------
# In-kernel noise: counter-based hash -> uniform(0,1) -> Gumbel(0,1).
# Portable (plain int ops) so it lowers in Mosaic *and* interpret mode, unlike
# pltpu.prng_*.  Mixing (seed, global index) through a multiply/xor/shift hash
# avoids the additive seed/block aliasing flagged in review.
# Note: 23 random bits truncate the Gumbel tails to roughly [-2.8, +16.6].
# -----------------------------------------------------------------------------
def _gumbel_from_index(idx_i32, seed_ref):
    seed = seed_ref[0].astype(jnp.uint32)
    v = idx_i32.astype(jnp.uint32) ^ (seed * jnp.uint32(0x9E3779B9))
    v = (v ^ (v >> 16)) * jnp.uint32(0x7FEB352D)
    v = (v ^ (v >> 15)) * jnp.uint32(0x846CA68B)
    v = v ^ (v >> 16)
    mant = (v >> 9).astype(jnp.int32).astype(jnp.float32)      # [0, 2^23)
    u = (mant + 0.5) * (1.0 / (1 << 23))                       # strictly (0, 1)
    return -jnp.log(-jnp.log(u))                               # Gumbel(0, 1)


# -----------------------------------------------------------------------------
# Fast path kernel (128 % C == 0): lane-dense (SUB, 128) tiles of the flat input;
# each 128-lane row holds 128//C whole categorical groups.
# -----------------------------------------------------------------------------
def _gumbel_lanes_kernel(seed_ref, x_ref, o_ref, *, num_categories):
    c = num_categories
    sub, lanes = x_ref.shape
    groups = lanes // c
    log2c = c.bit_length() - 1            # C divides 128 => power of two

    x = x_ref[...]

    # Gumbel(0,1) noise.
    row = lax.broadcasted_iota(jnp.int32, (sub, lanes), 0)
    col = lax.broadcasted_iota(jnp.int32, (sub, lanes), 1)
    idx = pl.program_id(0) * (sub * lanes) + row * lanes + col
    g = _gumbel_from_index(idx, seed_ref)

    # One-hot gather (lanes->groups) / scatter (groups->lanes) matrices.  Tiny
    # constants rebuilt per step; the matmuls run on the otherwise-idle MXU.
    lane_g = lax.broadcasted_iota(jnp.int32, (lanes, groups), 0) >> log2c
    grp_g = lax.broadcasted_iota(jnp.int32, (lanes, groups), 1)
    gather = (lane_g == grp_g).astype(jnp.float32)              # (128, G)
    lane_s = lax.broadcasted_iota(jnp.int32, (groups, lanes), 1) >> log2c
    grp_s = lax.broadcasted_iota(jnp.int32, (groups, lanes), 0)
    scatter = (lane_s == grp_s).astype(jnp.float32)             # (G, 128)

    # Numerically-stable per-group shift (softmax is shift-invariant): exact
    # group mean via matmul, floored at row_max - 60 so exp() can never
    # overflow; the -84 clamp below turns the (pathological, inter-group
    # spread > ~144) all-underflow case into a graceful result instead of NaN.
    row_max = jnp.max(x, axis=-1, keepdims=True)                # (SUB, 1)
    grp_mean = jnp.dot(x, gather, preferred_element_type=jnp.float32) * (1.0 / c)
    shift_c = jnp.maximum(grp_mean, row_max - 60.0)             # (SUB, G)
    shift = jnp.dot(shift_c, scatter, preferred_element_type=jnp.float32)

    z = x - shift + g
    if GUMBEL_TEMP != 1.0:                # statically elided for tau == 1
        z = z * (1.0 / GUMBEL_TEMP)
    z = jnp.maximum(z, -84.0)
    e = jnp.exp(z)

    # Segmented softmax: group sums on MXU, ONE reciprocal per group, scatter
    # back, normalize with a VALU multiply.
    denom_c = jnp.dot(e, gather, preferred_element_type=jnp.float32)   # (SUB, G)
    inv_c = 1.0 / denom_c
    o_ref[...] = e * jnp.dot(inv_c, scatter, preferred_element_type=jnp.float32)


# -----------------------------------------------------------------------------
# General fallback (128 % C != 0): one categorical group per (lane-sparse) row.
# Correct for any C; slower, but keeps HBM traffic minimal and blocks bounded.
# -----------------------------------------------------------------------------
def _gumbel_rows_kernel(seed_ref, x_ref, o_ref):
    rb, c = x_ref.shape
    x = x_ref[...]

    row = lax.broadcasted_iota(jnp.int32, (rb, c), 0)
    col = lax.broadcasted_iota(jnp.int32, (rb, c), 1)
    idx = pl.program_id(0) * (rb * c) + row * c + col
    g = _gumbel_from_index(idx, seed_ref)

    z = x + g
    if GUMBEL_TEMP != 1.0:
        z = z * (1.0 / GUMBEL_TEMP)
    z = z - jnp.max(z, axis=-1, keepdims=True)
    e = jnp.exp(z)
    inv = 1.0 / jnp.sum(e, axis=-1, keepdims=True)    # one reciprocal per group
    o_ref[...] = e * inv


def _choose_flat_tiling(total):
    """Tile `total` contiguous f32 elements as a (rows, 128) array.

    Returns (padded_rows, block_rows, steps).  Prefers a multiple-of-8 block
    that divides the row count exactly (no pad copy) with >= 2 grid steps
    (v7x has two TensorCores); otherwise pads up to whole blocks."""
    m = pl.cdiv(total, _LANES)
    want = 2 if m >= 16 else 1
    if total % _LANES == 0:
        best = 0
        for s in range(8, min(_SUB_BLOCK, m) + 1, 8):
            if m % s == 0 and m // s >= want:
                best = s
        if best:
            return m, best, m // best
        if m <= _SUB_BLOCK:
            return m, m, 1            # one small full-extent block (legal)
    sub = min(_SUB_BLOCK, _round_up(pl.cdiv(m, want), 8))
    steps = pl.cdiv(m, sub)
    return steps * sub, sub, steps


@partial(jax.jit, static_argnames=("dim", "num_categories"))
def gumbel_module_forward(x, seed, *, dim, num_categories):
    """Pallas implementation of GumbelModule.forward.

    x:    (N, num_categories * dim) float32 logits
    seed: (1,) int32 -- explicit seed (PyTorch draws fresh implicit noise each
          call; here noise is a deterministic function of (seed, element index))
    returns (N, num_categories * dim) float32 soft Gumbel-softmax samples.
    """
    n, feat = x.shape
    assert feat == num_categories * dim, "x.shape[1] != num_categories * dim"
    c = num_categories
    x = x.astype(jnp.float32)
    total = n * feat

    if _LANES % c == 0:
        # ---- fast path: flat lane-dense (rows, 128) view, no transposes ----
        m_pad, sub, steps = _choose_flat_tiling(total)
        flat = x.reshape(-1)
        if m_pad * _LANES != total:
            flat = jnp.pad(flat, (0, m_pad * _LANES - total))
        xf = flat.reshape(m_pad, _LANES)

        grid_spec = pltpu.PrefetchScalarGridSpec(
            num_scalar_prefetch=1,                         # seed -> SMEM
            grid=(steps,),
            in_specs=[pl.BlockSpec((sub, _LANES), lambda i, s_ref: (i, 0))],
            out_specs=pl.BlockSpec((sub, _LANES), lambda i, s_ref: (i, 0)),
        )
        out = pl.pallas_call(
            partial(_gumbel_lanes_kernel, num_categories=c),
            grid_spec=grid_spec,
            out_shape=jax.ShapeDtypeStruct((m_pad, _LANES), jnp.float32),
            compiler_params=pltpu.CompilerParams(
                dimension_semantics=("parallel",)),
        )(seed, xf)

        if m_pad * _LANES != total:
            out = out.reshape(-1)[:total]
        return out.reshape(n, feat)

    # ---- general fallback: one categorical group per row -------------------
    # TODO(synk): lane-dense handling for num_categories that do not divide 128.
    r = n * dim
    if r <= _SUB_BLOCK:
        r_pad, r_blk, steps = r, r, 1
    else:
        r_blk = _SUB_BLOCK
        steps = pl.cdiv(r, r_blk)
        r_pad = steps * r_blk
    xr = x.reshape(r, c)
    if r_pad != r:
        xr = jnp.pad(xr, ((0, r_pad - r), (0, 0)))

    grid_spec = pltpu.PrefetchScalarGridSpec(
        num_scalar_prefetch=1,
        grid=(steps,),
        in_specs=[pl.BlockSpec((r_blk, c), lambda i, s_ref: (i, 0))],
        out_specs=pl.BlockSpec((r_blk, c), lambda i, s_ref: (i, 0)),
    )
    out = pl.pallas_call(
        _gumbel_rows_kernel,
        grid_spec=grid_spec,
        out_shape=jax.ShapeDtypeStruct((r_pad, c), jnp.float32),
        compiler_params=pltpu.CompilerParams(dimension_semantics=("parallel",)),
    )(seed, xr)
    if r_pad != r:
        out = out[:r]
    return out.reshape(n, feat)


if __name__ == "__main__":
    key = jax.random.PRNGKey(0)
    kx, kx2 = jax.random.split(key, 2)

    # Fast path: C=8 divides 128.  x: (16, 128); flat (16, 128) view -> 2-step grid.
    BATCH, DIM, NCAT = 16, 16, 8
    x = jax.random.normal(kx, (BATCH, DIM * NCAT), dtype=jnp.float32)
    seed = jnp.array([1234], dtype=jnp.int32)

    y = jax.block_until_ready(
        gumbel_module_forward(x, seed, dim=DIM, num_categories=NCAT))
    assert y.shape == (BATCH, DIM * NCAT)
    assert bool(jnp.all(jnp.isfinite(y)))
    assert bool(jnp.all((y >= 0.0) & (y <= 1.0)))
    sums = y.reshape(BATCH, DIM, NCAT).sum(-1)
    assert bool(jnp.allclose(sums, 1.0, atol=1e-4))

    # Semantic check: a +100 dominating logit (>> Gumbel-noise spread) must win ~always.
    x_dom = (jnp.zeros((BATCH, DIM, NCAT), jnp.float32)
             .at[:, :, 3].set(100.0)
             .reshape(BATCH, DIM * NCAT))
    y_dom = jax.block_until_ready(
        gumbel_module_forward(x_dom, seed + 1, dim=DIM, num_categories=NCAT))
    assert bool(jnp.all(y_dom.reshape(BATCH, DIM, NCAT)[:, :, 3] > 0.99))

    # General fallback path: C=10 does not divide 128.
    B2, D2, C2 = 4, 3, 10
    x2 = jax.random.normal(kx2, (B2, D2 * C2), dtype=jnp.float32)
    y2 = jax.block_until_ready(
        gumbel_module_forward(x2, seed, dim=D2, num_categories=C2))
    assert bool(jnp.all(jnp.isfinite(y2)))
    assert bool(jnp.allclose(y2.reshape(B2, D2, C2).sum(-1), 1.0, atol=1e-4))

    print("KERNEL_OK")
</pallas_src>

<mosaic_0001>
module attributes {stable_mosaic.version = 11 : i64} {
  func.func @_gumbel_lanes_kernel(%arg0: i32, %arg1: memref<1xi32, #tpu.memory_space<smem>>, %arg2: memref<8x128xf32, #tpu.memory_space<vmem>>, %arg3: memref<8x128xf32, #tpu.memory_space<vmem>>) attributes {dimension_semantics = [#tpu.dimension_semantics<parallel>], iteration_bounds = array<i64: 2>, scalar_prefetch = 1 : i64, scratch_operands = 0 : i64, tpu.core_type = #tpu.core_type<tc>, window_params = [{transform_indices = @transform_0, window_bounds = array<i64: 8, 128>}, {transform_indices = @transform_1, window_bounds = array<i64: 8, 128>}]} {
    %c0 = arith.constant 0 : index
    %c0_0 = arith.constant 0 : index
    %0 = vector.load %arg2[%c0, %c0_0] : memref<8x128xf32, #tpu.memory_space<vmem>>, vector<8x128xf32>
    %1 = tpu.iota {dimensions = array<i32: 0>} : vector<8x128xi32>
    %2 = tpu.iota {dimensions = array<i32: 1>} : vector<8x128xi32>
    %c1024_i32 = arith.constant 1024 : i32
    %3 = arith.muli %arg0, %c1024_i32 : i32
    %c128_i32 = arith.constant 128 : i32
    %4 = vector.broadcast %c128_i32 : i32 to vector<8x128xi32>
    %5 = arith.muli %1, %4 : vector<8x128xi32>
    %6 = vector.broadcast %3 : i32 to vector<8x128xi32>
    %7 = arith.addi %6, %5 : vector<8x128xi32>
    %8 = arith.addi %7, %2 : vector<8x128xi32>
    %c0_1 = arith.constant 0 : index
    %9 = memref.load %arg1[%c0_1] : memref<1xi32, #tpu.memory_space<smem>>
    %c-1640531527_i32 = arith.constant -1640531527 : i32
    %10 = arith.muli %9, %c-1640531527_i32 : i32
    %11 = vector.broadcast %10 : i32 to vector<8x128xi32>
    %12 = arith.xori %8, %11 : vector<8x128xi32>
    %c16_i32 = arith.constant 16 : i32
    %13 = vector.broadcast %c16_i32 : i32 to vector<8x128xi32>
    %14 = arith.shrui %12, %13 : vector<8x128xi32>
    %15 = arith.xori %12, %14 : vector<8x128xi32>
    %c2146121005_i32 = arith.constant 2146121005 : i32
    %16 = vector.broadcast %c2146121005_i32 : i32 to vector<8x128xi32>
    %17 = arith.muli %15, %16 : vector<8x128xi32>
    %c15_i32 = arith.constant 15 : i32
    %18 = vector.broadcast %c15_i32 : i32 to vector<8x128xi32>
    %19 = arith.shrui %17, %18 : vector<8x128xi32>
    %20 = arith.xori %17, %19 : vector<8x128xi32>
    %c-2073254261_i32 = arith.constant -2073254261 : i32
    %21 = vector.broadcast %c-2073254261_i32 : i32 to vector<8x128xi32>
    %22 = arith.muli %20, %21 : vector<8x128xi32>
    %c16_i32_2 = arith.constant 16 : i32
    %23 = vector.broadcast %c16_i32_2 : i32 to vector<8x128xi32>
    %24 = arith.shrui %22, %23 : vector<8x128xi32>
    %25 = arith.xori %22, %24 : vector<8x128xi32>
    %c9_i32 = arith.constant 9 : i32
    %26 = vector.broadcast %c9_i32 : i32 to vector<8x128xi32>
    %27 = arith.shrui %25, %26 : vector<8x128xi32>
    %28 = arith.sitofp %27 : vector<8x128xi32> to vector<8x128xf32>
    %cst = arith.constant 5.000000e-01 : f32
    %29 = vector.broadcast %cst : f32 to vector<8x128xf32>
    %30 = arith.addf %28, %29 : vector<8x128xf32>
    %cst_3 = arith.constant 1.1920929E-7 : f32
    %31 = vector.broadcast %cst_3 : f32 to vector<8x128xf32>
    %32 = arith.mulf %30, %31 : vector<8x128xf32>
    %33 = math.log %32 : vector<8x128xf32>
    %cst_4 = arith.constant 0.000000e+00 : f32
    %34 = vector.broadcast %cst_4 : f32 to vector<8x128xf32>
    %35 = arith.subf %34, %33 : vector<8x128xf32>
    %36 = math.log %35 : vector<8x128xf32>
    %cst_5 = arith.constant 0.000000e+00 : f32
    %37 = vector.broadcast %cst_5 : f32 to vector<8x128xf32>
    %38 = arith.subf %37, %36 : vector<8x128xf32>
    %39 = tpu.iota {dimensions = array<i32: 0>} : vector<128x16xi32>
    %c3_i32 = arith.constant 3 : i32
    %40 = vector.broadcast %c3_i32 : i32 to vector<128x16xi32>
    %41 = arith.shrsi %39, %40 : vector<128x16xi32>
    %42 = tpu.iota {dimensions = array<i32: 1>} : vector<128x16xi32>
    %43 = arith.cmpi eq, %41, %42 : vector<128x16xi32>
    %44 = arith.extui %43 : vector<128x16xi1> to vector<128x16xi32>
    %45 = arith.sitofp %44 : vector<128x16xi32> to vector<128x16xf32>
    %46 = tpu.iota {dimensions = array<i32: 1>} : vector<16x128xi32>
    %c3_i32_6 = arith.constant 3 : i32
    %47 = vector.broadcast %c3_i32_6 : i32 to vector<16x128xi32>
    %48 = arith.shrsi %46, %47 : vector<16x128xi32>
    %49 = tpu.iota {dimensions = array<i32: 0>} : vector<16x128xi32>
    %50 = arith.cmpi eq, %48, %49 : vector<16x128xi32>
    %51 = arith.extui %50 : vector<16x128xi1> to vector<16x128xi32>
    %52 = arith.sitofp %51 : vector<16x128xi32> to vector<16x128xf32>
    %cst_7 = arith.constant dense<0xFF800000> : vector<8xf32>
    %53 = vector.multi_reduction <maximumf>, %0, %cst_7 [1] : vector<8x128xf32> to vector<8xf32>
    %54 = vector.shape_cast %53 : vector<8xf32> to vector<8x1xf32>
    %cst_8 = arith.constant dense<0.000000e+00> : vector<8x16xf32>
    %55 = tpu.matmul %0, %45, %cst_8 {dimension_numbers = #tpu.dot_dimension_numbers<[1], [0], [0], [1], [0, 0, 1, 1], [], []>} : vector<8x128xf32>, vector<128x16xf32>, vector<8x16xf32> -> vector<8x16xf32>
    %cst_9 = arith.constant 1.250000e-01 : f32
    %56 = vector.broadcast %cst_9 : f32 to vector<8x16xf32>
    %57 = arith.mulf %55, %56 : vector<8x16xf32>
    %cst_10 = arith.constant 6.000000e+01 : f32
    %58 = vector.broadcast %cst_10 : f32 to vector<8x1xf32>
    %59 = arith.subf %54, %58 : vector<8x1xf32>
    %60 = vector.broadcast %59 : vector<8x1xf32> to vector<8x16xf32>
    %61 = arith.maximumf %57, %60 : vector<8x16xf32>
    %cst_11 = arith.constant dense<0.000000e+00> : vector<8x128xf32>
    %62 = tpu.matmul %61, %52, %cst_11 {dimension_numbers = #tpu.dot_dimension_numbers<[1], [0], [0], [1], [0, 0, 1, 1], [], []>} : vector<8x16xf32>, vector<16x128xf32>, vector<8x128xf32> -> vector<8x128xf32>
    %63 = arith.subf %0, %62 : vector<8x128xf32>
    %64 = arith.addf %63, %38 : vector<8x128xf32>
    %cst_12 = arith.constant -8.400000e+01 : f32
    %65 = vector.broadcast %cst_12 : f32 to vector<8x128xf32>
    %66 = arith.maximumf %64, %65 : vector<8x128xf32>
    %67 = math.exp %66 : vector<8x128xf32>
    %cst_13 = arith.constant dense<0.000000e+00> : vector<8x16xf32>
    %68 = tpu.matmul %67, %45, %cst_13 {dimension_numbers = #tpu.dot_dimension_numbers<[1], [0], [0], [1], [0, 0, 1, 1], [], []>} : vector<8x128xf32>, vector<128x16xf32>, vector<8x16xf32> -> vector<8x16xf32>
    %cst_14 = arith.constant 1.000000e+00 : f32
    %69 = vector.broadcast %cst_14 : f32 to vector<8x16xf32>
    %70 = arith.divf %69, %68 : vector<8x16xf32>
    %cst_15 = arith.constant dense<0.000000e+00> : vector<8x128xf32>
    %71 = tpu.matmul %70, %52, %cst_15 {dimension_numbers = #tpu.dot_dimension_numbers<[1], [0], [0], [1], [0, 0, 1, 1], [], []>} : vector<8x16xf32>, vector<16x128xf32>, vector<8x128xf32> -> vector<8x128xf32>
    %72 = arith.mulf %67, %71 : vector<8x128xf32>
    %c0_16 = arith.constant 0 : index
    %c0_17 = arith.constant 0 : index
    %73 = vector.load %arg3[%c0_16, %c0_17] : memref<8x128xf32, #tpu.memory_space<vmem>>, vector<8x128xf32>
    tpu.vector_store %arg3[%c0_16, %c0_17], %72 {strides = array<i32>} : memref<8x128xf32, #tpu.memory_space<vmem>>, vector<8x128xf32>,
    return
  }
  func.func @transform_0(%arg0: i32, %arg1: memref<1xi32, #tpu.memory_space<smem>>) -> (i32, i32) {
    %c0_i32 = arith.constant 0 : i32
    %c0_i32_0 = arith.constant 0 : i32
    return %arg0, %c0_i32 : i32, i32
  }
  func.func @transform_1(%arg0: i32, %arg1: memref<1xi32, #tpu.memory_space<smem>>) -> (i32, i32) {
    %c0_i32 = arith.constant 0 : i32
    %c0_i32_0 = arith.constant 0 : i32
    return %arg0, %c0_i32 : i32, i32
  }
}

</mosaic_0001>

<bundles_post_ra>
// kernel: gumbel_module_forward.1
= control target key start
LH: loop header
LB: loop body
LE: loop exit
PB: predicated region body
PF: predicated region fallthrough
CT: control target
= control target key end

     0   :  { %s911_s0 = inlined_call_operand.<no memory space> [shape: s32[1], index: 0, kind: input, shape index: {}]   ;;  %s912_s1 = inlined_call_operand.hbm [shape: f32[16,128], index: 1, kind: input, shape index: {}]   ;;  %s913_s2 = inlined_call_operand.hbm [shape: f32[16,128], index: 2, kind: output, shape index: {}]  }
   0x1   :  { %7 = sst [smem:[#allocation3]] %s911_s0 }
   0x2   :  { %8 = vsyncpa [#allocation5], 0 }
   0x3   :  { %10 = vsyncpa [#allocation5 + $0x1], 0 }
   0x4   :  { %11 = vsyncpa [#allocation6], 0 }
   0x5   :  { %13 = vsyncpa [#allocation6 + $0x1], 0  ;;  %s696_s11 = smov 0   ;;  %s698_s12 = smov 0  }
   0x6   :  { %s700_s13 = smov 0   ;;  %s702_s14 = smov 0  }
   0x7 LB: > { %s717_s0 = sadd.s32 4294967295, %s675_s14   ;;  %s454_s15 = sadd.s32 4294967294, %s675_s14   ;;  %s675_s14 = sphi %s702_s14, %s923_s14   ;;  %s671_s13 = sphi %s700_s13, %s922_s13   ;;  %s667_s12 = sphi %s698_s12, %s921_s12   ;;  %s663_s11 = sphi %s696_s11, %s920_s11  }
   0x8   : > { %s721_s16 = sadd.s32 1, %s675_s14   ;;  %s26_s17 = sadd.s32 1, %s671_s13 }
   0x9   : > { %s23_s18 = ssub.s32 %s675_s14, %s721_s16  ;;  %p33_p0 = scmp.ne.s32.totalorder %s671_s13, %s667_s12 }
   0xa   : > { %p24_p1 = scmp.eq.s32.totalorder %s23_s18, 0  ;;  %p34_p2 = scmp.eq.s32.totalorder %s675_s14, 0 }
   0xb   : > { %p39_p3 = scmp.ne.s32.totalorder %s667_s12, %s663_s11  ;;  %p40_p4 = scmp.eq.s32.totalorder %s717_s0, 0 }
   0xc   : > { %s733_s19 = scalar_select %p24_p1, %s671_s13, %s26_s17  }
   0xd   : > { %p735_p5 = por %p34_p2, %p33_p0  ;;  %p739_p6 = por %p40_p4, %p39_p3 }
   0xe   : > { %p63_p7 = scmp.eq.s32.totalorder %s717_s0, 1  ;;  %p69_p8 = scmp.eq.s32.totalorder %s454_s15, 1 }
   0xf   : > { %p536_p10 = scmp.lt.s32.totalorder %s675_s14, 2  ;;  %s89_s24 = sand.u32 1, %s671_s13  }
  0x10   : > { %p746_p11 = por %p63_p7, %p33_p0  ;;  %p750_p12 = por %p69_p8, %p39_p3 }
  0x11   : > { %s458_s25 = sshll.u32 %s675_s14, 3  ;;  %s457_s26 = sshll.u32 %s89_s24, 3 }
  0x12   : > { %s97_s29 = scalar_lea.hbm %s912_s1, %s458_s25  ;;  %s93_s3 = scalar_lea.vmem [#allocation4], %s457_s26 }
  0x13   : > { %s99_s30 = sshll.u32 %s97_s29, 4  ;;  %s101_s4 = sshll.u32 %s93_s3, 4  ;;  %s100_s30 = int_to_ptr.hbm [resolvable:$true] %s99_s30  ;;  %s102_s4 = int_to_ptr.vmem [resolvable:$true] %s101_s4 }
  0x14   : > { %p761_p13 = pnand %p536_p10, %p735_p5  ;;  %p459_p0 = scmp.ge.s32.totalorder %s675_s14, 1 }
  0x15   : > { %p106_p1 = scmp.lt.s32.totalorder %s675_s14, 3  ;;  %s90_s6 = scalar_lea.sflag [#allocation5], %s89_s24 }
  0x16   : > { %s579_s7 = sshra.s32 %s100_s30, 4  ;;  %p583_p3 = pneg %p761_p13  ;;  %s580_s7 = int_to_ptr.hbm [resolvable:$true] %s579_s7 }
  0x17   : > { %s581_s8 = scalar_lea.hbm %s580_s7, 8  ;;  %s586_s15 = scalar_lea.hbm %s912_s1, 16 }
  0x18   : > { %p582_p2 = scmp.ne.s32.totalorder %s580_s7, %s581_s8  ;;  %p587_p5 = scmp.lt.s32.totalorder %s580_s7, %s912_s1 }
  0x19   : > { %p588_p8 = scmp.lt.s32.totalorder %s586_s15, %s581_s8 }
  0x1a   : > { %p584_p4 = pnand %p583_p3, %p582_p2 }
  0x1b   : > { %p589_p10 = por %p588_p8, %p587_p5 }
  0x1c   : > { %p585_p7 = pneg %p584_p4 }
  0x1e   : > { %p590_p9 = pnand %p589_p10, %p585_p7 }
  0x20   : > { %593 = shalt.err (!%p590_p9)
}
  0x21   : > { %531 = dma.hbm_to_vmem [thread:$0]  (!%p761_p13), %s100_s30, 128, %s102_s4, %s90_s6  }
  0x22   : > { %p107_p2 = pnand %p459_p0, %p106_p1 }
  0x23   : > { %s782_s20 = sand.u32 (!%p107_p2), 1, %s667_s12  }
  0x24   : > { %110 = sbr.rel (%p107_p2) target bundleno = 638 (0x27e), region = 24  ;;  %s460_s24 = sshll.u32 (!%p107_p2), %s782_s20, 3 }
  0x25   : > { %s113_s25 = scalar_lea.sflag (!%p107_p2), [#allocation5], %s782_s20  ;;  %s116_s26 = scalar_lea.vmem (!%p107_p2), [#allocation4], %s460_s24 }
  0x29   : > { %v137_v0 = vlaneseq }
  0x2a   : > { %654 = dma.done.wait (%p739_p6), %s113_s25, 128  }
  0x2b   : > { %656 = vsyncadd (%p739_p6), %s113_s25, 4294967168  ;;  %v792_v1 = vshrl.u32 %v137_v0, 7  ;;  %v794_v2 = vand.u32 127, %v137_v0  ;;  %v677_v13 = vmov 1.0   ;;  %v805_v14 = vld [vmem:[%s116_s26] sm:$0xff]  ;;  %s146_s21 = sld [smem:[#allocation3]] }
  0x2c   : > { %254 = vmax.xlane.f32.xlu0 %v805_v14  ;;  %s462_s27 = sshll.u32 %s717_s0, 10  ;;  %s521_s29 = sshll.u32 %s717_s0, 3 }
  0x2d   : > { %v182_v3 = vadd.s32 120, %v792_v1  ;;  %v181_v4 = vadd.s32 112, %v792_v1  ;;  %v180_v5 = vadd.s32 104, %v792_v1  ;;  %v179_v6 = vadd.s32 96, %v792_v1  ;;  %s379_s4 = scalar_lea.hbm %s913_s2, %s521_s29  ;;  %s135_s5 = scalar_lea.vmem [#allocation7], %s460_s24 }
  0x2e   : > { %v178_v10 = vadd.s32 88, %v792_v1  ;;  %v177_v12 = vadd.s32 80, %v792_v1  ;;  %v176_v16 = vadd.s32 72, %v792_v1  ;;  %v175_v18 = vadd.s32 64, %v792_v1  ;;  %s381_s6 = sshll.u32 %s135_s5, 4  ;;  %s383_s7 = sshll.u32 %s379_s4, 4  ;;  %s382_s6 = int_to_ptr.vmem [resolvable:$true] %s381_s6  ;;  %s384_s7 = int_to_ptr.hbm [resolvable:$true] %s383_s7 }
  0x2f   : > { %v198_v7 = vshra.s32 %v182_v3, 3  ;;  %v197_v8 = vshra.s32 %v181_v4, 3  ;;  %v196_v9 = vshra.s32 %v180_v5, 3  ;;  %v195_v11 = vshra.s32 %v179_v6, 3  ;;  %s369_s8 = scalar_lea.sflag [#allocation6], %s782_s20  ;;  %s623_s9 = sshra.s32 %s384_s7, 4  ;;  %s624_s9 = int_to_ptr.hbm [resolvable:$true] %s623_s9 }
  0x30   : > { %v194_v15 = vshra.s32 %v178_v10, 3  ;;  %v193_v17 = vshra.s32 %v177_v12, 3  ;;  %v192_v19 = vshra.s32 %v176_v16, 3  ;;  %v174_v20 = vadd.s32 56, %v792_v1  ;;  %s625_s10 = scalar_lea.hbm %s624_s9, 8  ;;  %s629_s17 = scalar_lea.hbm %s913_s2, 16 }
  0x31   : > { %vm214_vm0 = vcmp.eq.s32.totalorder %v198_v7, %v794_v2  ;;  %vm213_vm1 = vcmp.eq.s32.totalorder %v197_v8, %v794_v2  ;;  %vm212_vm2 = vcmp.eq.s32.totalorder %v196_v9, %v794_v2  ;;  %vm211_vm3 = vcmp.eq.s32.totalorder %v195_v11, %v794_v2  ;;  %s147_s28 = smul.u32 2654435769, %s146_s21  ;;  %p626_p6 = scmp.ne.s32.totalorder %s624_s9, %s625_s10 }
  0x32   : > { %481 = vmatpush.msk.msra.mxu0 %vm214_vm0, %v677_v13  ;;  %501 = vmatpush.msk.msra.mxu2 %vm214_vm0, %v677_v13  ;;  %vm210_vm4 = vcmp.eq.s32.totalorder %v194_v15, %v794_v2  ;;  %vm209_vm5 = vcmp.eq.s32.totalorder %v193_v17, %v794_v2  ;;  %v191_v21 = vshra.s32 %v175_v18, 3  ;;  %v173_v22 = vadd.s32 48, %v792_v1  ;;  %p630_p0 = scmp.lt.s32.totalorder %s624_s9, %s913_s2  ;;  %p631_p1 = scmp.lt.s32.totalorder %s629_s17, %s625_s10 }
  0x33   : > { %vm208_vm6 = vcmp.eq.s32.totalorder %v192_v19, %v794_v2  ;;  %v190_v23 = vshra.s32 %v174_v20, 3  ;;  %v172_v24 = vadd.s32 40, %v792_v1  ;;  %v171_v26 = vadd.s32 32, %v792_v1  ;;  %p627_p9 = pnand %p626_p6, %p746_p11 }
  0x34   : > { %482 = vmatpush.msk.msra.mxu0 %vm213_vm1, %v677_v13  ;;  %502 = vmatpush.msk.msra.mxu2 %vm213_vm1, %v677_v13  ;;  %vm207_vm7 = vcmp.eq.s32.totalorder %v191_v21, %v794_v2  ;;  %v189_v25 = vshra.s32 %v173_v22, 3  ;;  %v170_v28 = vadd.s32 24, %v792_v1  ;;  %v169_v30 = vadd.s32 16, %v792_v1  ;;  %p632_p3 = por %p631_p1, %p630_p0 }
  0x35   : > { %vm206_vm8 = vcmp.eq.s32.totalorder %v190_v23, %v794_v2  ;;  %v188_v27 = vshra.s32 %v172_v24, 3  ;;  %v187_v29 = vshra.s32 %v171_v26, 3  ;;  %v168_v32 = vadd.s32 8, %v792_v1  ;;  %p628_p13 = pneg %p627_p9 }
  0x36   : > { %483 = vmatpush.msk.msra.mxu0 %vm212_vm2, %v677_v13  ;;  %503 = vmatpush.msk.msra.mxu2 %vm212_vm2, %v677_v13  ;;  %vm205_vm9 = vcmp.eq.s32.totalorder %v189_v25, %v794_v2  ;;  %v186_v31 = vshra.s32 %v170_v28, 3  ;;  %v185_v33 = vshra.s32 %v169_v30, 3  ;;  %v183_v35 = vshra.s32 %v792_v1, 3 }
  0x37   : > { %vm204_vm10 = vcmp.eq.s32.totalorder %v188_v27, %v794_v2  ;;  %vm203_vm11 = vcmp.eq.s32.totalorder %v187_v29, %v794_v2  ;;  %v184_v34 = vshra.s32 %v168_v32, 3  ;;  %v247_v36 = vshra.s32 %v794_v2, 3  ;;  %p633_p4 = pnand %p632_p3, %p628_p13 }
  0x38   : > { %484 = vmatpush.msk.msra.mxu0 %vm211_vm3, %v677_v13  ;;  %504 = vmatpush.msk.msra.mxu2 %vm211_vm3, %v677_v13  ;;  %vm202_vm12 = vcmp.eq.s32.totalorder %v186_v31, %v794_v2  ;;  %vm201_vm13 = vcmp.eq.s32.totalorder %v185_v33, %v794_v2  ;;  %vm199_vm15 = vcmp.eq.s32.totalorder %v183_v35, %v794_v2  ;;  %vm279_vm2 = vcmask 130048  }
  0x39   : > { %vm200_vm14 = vcmp.eq.s32.totalorder %v184_v34, %v794_v2  ;;  %vm249_vm0 = vcmp.eq.s32.totalorder %v247_v36, %v168_v32  ;;  %vm248_vm1 = vcmp.eq.s32.totalorder %v247_v36, %v792_v1  ;;  %v142_v42 = vmul.u32 128, %v792_v1 }
  0x3a   : > { %485 = vmatpush.msk.msra.mxu0 %vm210_vm4, %v677_v13  ;;  %505 = vmatpush.msk.msra.mxu2 %vm210_vm4, %v677_v13  ;;  %v143_v43 = vstv %s462_s27  ;;  %v148_v46 = vstv %s147_s28 }
  0x3b   : > { %498 = vmatpush.msk.msra.mxu1 %vm249_vm0, %v677_v13  ;;  %517 = vmatpush.msk.msra.mxu3 %vm249_vm0, %v677_v13  ;;  %v144_v44 = vadd.s32 %v143_v43, %v142_v42 }
  0x3c   : > { %486 = vmatpush.msk.msra.mxu0 %vm209_vm5, %v677_v13  ;;  %506 = vmatpush.msk.msra.mxu2 %vm209_vm5, %v677_v13 }
  0x3d   : > { %499 = vmatpush.msk.msra.mxu1 %vm248_vm1, %v677_v13  ;;  %518 = vmatpush.msk.msra.mxu3 %vm248_vm1, %v677_v13  ;;  %v145_v45 = vadd.s32 %v144_v44, %v794_v2 }
  0x3e   : > { %487 = vmatpush.msk.msra.mxu0 %vm208_vm6, %v677_v13  ;;  %507 = vmatpush.msk.msra.mxu2 %vm208_vm6, %v677_v13 }
  0x3f   : > { %v149_v47 = vxor.u32 %v148_v46, %v145_v45 }
  0x40   : > { %488 = vmatpush.msk.msra.mxu0 %vm207_vm7, %v677_v13  ;;  %508 = vmatpush.msk.msra.mxu2 %vm207_vm7, %v677_v13 }
  0x41   : > { %v150_v48 = vshrl.u32 %v149_v47, 16 }
  0x42   : > { %489 = vmatpush.msk.msra.mxu0 %vm206_vm8, %v677_v13  ;;  %509 = vmatpush.msk.msra.mxu2 %vm206_vm8, %v677_v13 }
  0x43   : > { %v151_v49 = vxor.u32 %v150_v48, %v149_v47 }
  0x44   : > { %490 = vmatpush.msk.msra.mxu0 %vm205_vm9, %v677_v13  ;;  %510 = vmatpush.msk.msra.mxu2 %vm205_vm9, %v677_v13 }
  0x45   : > { %v152_v50 = vmul.u32 2146121005, %v151_v49 }
  0x46   : > { %491 = vmatpush.msk.msra.mxu0 %vm204_vm10, %v677_v13  ;;  %511 = vmatpush.msk.msra.mxu2 %vm204_vm10, %v677_v13 }
  0x47   : > { %v153_v51 = vshrl.u32 %v152_v50, 15 }
  0x48   : > { %492 = vmatpush.msk.msra.mxu0 %vm203_vm11, %v677_v13  ;;  %512 = vmatpush.msk.msra.mxu2 %vm203_vm11, %v677_v13 }
  0x49   : > { %v154_v52 = vxor.u32 %v153_v51, %v152_v50 }
  0x4a   : > { %493 = vmatpush.msk.msra.mxu0 %vm202_vm12, %v677_v13  ;;  %513 = vmatpush.msk.msra.mxu2 %vm202_vm12, %v677_v13 }
  0x4b   : > { %v155_v53 = vmul.u32 2221713035, %v154_v52 }
  0x4c   : > { %494 = vmatpush.msk.msra.mxu0 %vm201_vm13, %v677_v13  ;;  %514 = vmatpush.msk.msra.mxu2 %vm201_vm13, %v677_v13 }
  0x4d   : > { %v156_v54 = vshrl.u32 %v155_v53, 16 }
  0x4e   : > { %495 = vmatpush.msk.msra.mxu0 %vm200_vm14, %v677_v13  ;;  %515 = vmatpush.msk.msra.mxu2 %vm200_vm14, %v677_v13 }
  0x4f   : > { %v157_v55 = vxor.u32 %v156_v54, %v155_v53 }
  0x50   : > { %496 = vmatpush.msk.msra.mxu0 %vm199_vm15, %v677_v13  ;;  %516 = vmatpush.msk.msra.mxu2 %vm199_vm15, %v677_v13 }
  0x51   : > { %272 = vmatmul.f32.vlgmr.msra.gmra.mxu0 %v805_v14  ;;  %v158_v56 = vshrl.u32 %v157_v55, 9 }
  0x53   : > { %v159_v57 = vcvt.s32.f32 %v158_v56 }
  0x55   : > { %v160_v58 = vadd.f32 0.5, %v159_v57 }
  0x57   : > { %v161_v59 = vmul.f32 1.1920929e-07, %v160_v58 }
  0x59   : > { %571 = vlog2.f32 %v161_v59 }
  0x5f   : > { %v572_v60 = vpop.eup %571 }
  0x60   : > { %v163_v61 = vmul.f32 0.6931472, %v572_v60 }
  0x62   : > { %v164_v62 = vsub.f32 0.0, %v163_v61 }
  0x64   : > { %573 = vlog2.f32 %v164_v62 }
  0x6a   : > { %v574_v63 = vpop.eup %573 }
  0x6b   : > { %v166_v0 = vmul.f32 0.6931472, %v574_v63 }
  0x6d   : > { %v167_v1 = vsub.f32 0.0, %v166_v0 }
  0x9f   : > { %v255_v37 = vpop.xlane.xlu0 %254 }
  0xa0   : > { %v497_v38 = vadd.f32 -60.0, %v255_v37 }
  0xce   : > { %v273_v39 = vpop.f32.mrf.mxu0 }
  0xcf   : > { %v276_v40 = vmul.f32 0.125, %v273_v39 }
  0xd1   : > { %v278_v41 = vmax.f32 %v276_v40, %v497_v38 }
  0xd3   : > { %500 = vmatmul.msk.f32.vlgmr.msra.gmra.mxu1 %vm279_vm2, %v278_v41 }
 0x150   : > { %v300_v2 = vpop.f32.mrf.mxu1 }
 0x151   : > { %v303_v3 = vsub.f32 %v805_v14, %v300_v2 }
 0x153   : > { %v304_v4 = vadd.f32 %v303_v3, %v167_v1 }
 0x155   : > { %v305_v5 = vmax.f32 %v304_v4, -84.0 }
 0x157   : > { %v306_v6 = vmul.f32 1.442695, %v305_v5 }
 0x159   : > { %575 = vpow2.f32 %v306_v6 }
 0x15f   : > { %v576_v7 = vpop.eup %575 }
 0x160   : > { %324 = vmatmul.f32.vlgmr.msra.gmra.mxu2 %v576_v7 }
 0x1e3   : > { %v325_v8 = vpop.f32.mrf.mxu2 }
 0x1e4   : > { %577 = vrcp.f32 %v325_v8  ;;  %v339_v12 = vand.u32 2147483648, %v325_v8  ;;  %v337_v15 = vand.u32 2147483647, %v325_v8  ;;  %vm333_vm4 = vweird.f32 %v325_v8 }
 0x1e6   : > { %v340_v14 = vor.u32 1.1754944e-38, %v339_v12  ;;  %vm338_vm6 = vcmp.eq.f32.partialorder %v337_v15, 8.507059e+37 }
 0x1ea   : > { %v578_v9 = vpop.eup %577 }
 0x1eb   : > { %v329_v10 = vmul.f32 %v578_v9, %v325_v8  ;;  %vm334_vm3 = vweird.f32 %v578_v9 }
 0x1ec   : > { %vm335_vm5 = vmor %vm333_vm4, %vm334_vm3 }
 0x1ed   : > { %v330_v11 = vsub.f32 1.0, %v329_v10 }
 0x1ef   : > { %v331_v13 = vmul.f32 %v578_v9, %v330_v11 }
 0x1f1   : > { %v332_v16 = vadd.f32 %v578_v9, %v331_v13 }
 0x1f3   : > { %v336_v17 = vsel %vm335_vm5, %v578_v9, %v332_v16 }
 0x1f4   : > { %v341_v18 = vsel %vm338_vm6, %v340_v14, %v336_v17 }
 0x1f5   : > { %519 = vmatmul.msk.f32.vlgmr.msra.gmra.mxu3 %vm279_vm2, %v341_v18 }
 0x278   : > { %v363_v19 = vpop.f32.mrf.mxu3 }
 0x279   : > { %v366_v20 = vmul.f32 %v576_v7, %v363_v19 }
 0x27b   : > { %367 = vst [vmem:[%s135_s5] sm:$0xff] %v366_v20 }
 0x27c   : > { %636 = shalt.err (!%p633_p4)
}
 0x27d   : > { %526 = dma.vmem_to_hbm [thread:$0]  (%p746_p11), %s382_s6, 128, %s384_s7, %s369_s8  }
 0x27e PF: > { %s395_s20 = sand.u32 1, %s663_s11   ;;  %p919_p7 = scmp.ge.s32.totalorder %s675_s14, 2 }
 0x27f   : > { %s396_s25 = scalar_lea.sflag [#allocation6], %s395_s20 }
 0x280   : > { %p533_p5 = pnand %p919_p7, %p750_p12 }
 0x282   : > { %p534_p8 = pneg %p533_p5 }
 0x284   : > { %658 = dma.done.wait (%p534_p8), %s396_s25, 128  }
 0x285   : > { %660 = vsyncadd (%p534_p8), %s396_s25, 4294967168  ;;  %p16_p10 = scmp.ge.s32.totalorder %s721_s16, 4   ;;  %s920_s11 = smov %s667_s12 }
 0x286   : > { %s921_s12 = smov %s671_s13  ;;  %s922_s13 = smov %s733_s19 }
 0x287   : > { %s923_s14 = smov %s721_s16  ;;  %18 = sbr.rel (!%p16_p10) target bundleno = 7 (0x7), region = 69 }
 0x28c   :  { %402 = vsyncpa [#allocation5], 1 }
 0x28d   :  { %404 = vsyncpa [#allocation5 + $0x1], 1 }
 0x28e   :  { %405 = vsyncpa [#allocation6], 1 }
 0x28f   :  { %407 = vsyncpa [#allocation6 + $0x1], 1 }

</bundles_post_ra>
